<compile_context>
chip_gen: v7x
topology: tpu7x:2x2x1
jax: 0.10.0
libtpu: 0.0.40
codegen_flags: <defaults>
</compile_context>

<pallas_src>
import jax
import jax.numpy as jnp
from jax import lax
from jax.experimental import pallas as pl
from jax.experimental.pallas import tpu as pltpu


def fixed_hidden_mlp_kernel(x_ref, wT_ref, b_ref, rand_ref, out_ref):
    x = x_ref[...]          # (8, 128)   padded input, lane-dense
    wT = wT_ref[...]        # (128, 128) linear weight, pre-transposed (in, out), zero-padded
    b = b_ref[...]          # (8, 128)   bias slab; padded rows/cols are exactly 0.0
    rw = rand_ref[...]      # (128, 128) fixed random weight, zero-padded

    # X = self.linear(X)
    h = jnp.dot(x, wT, preferred_element_type=jnp.float32) + b
    # X = relu(X @ rand_weight)
    h = jnp.maximum(jnp.dot(h, rw, preferred_element_type=jnp.float32), 0.0)
    # X = self.linear(X)   (same shared layer)
    h = jnp.dot(h, wT, preferred_element_type=jnp.float32) + b

    # ---- epilogue: one fused cross-lane reduce for both sum and abs-sum ----
    bp = h.shape[0]
    stacked = jnp.concatenate([h, jnp.abs(h)], axis=0)            # (16, 128)
    rows = jnp.sum(stacked, axis=-1, keepdims=True)               # (16, 1)
    s = jnp.sum(rows[:bp, :], keepdims=True)                      # (1, 1)  = sum(h)
    s_abs = jnp.sum(rows[bp:, :], keepdims=True)                  # (1, 1)  = sum(|h|)

    # ---- while h.abs().sum() > 1: h /= 2  -> exact closed-form halving count ----
    # n = smallest n >= 0 with s_abs * 2^-n <= 1, derived from IEEE exponent bits:
    #   s_abs = 1.f * 2^(E-127);  n = max(0, (E-127) + (f != 0))
    bits = pltpu.bitcast(s_abs, jnp.int32)                        # sign bit is 0 (s_abs >= 0)
    e_unbiased = ((bits >> 23) & 0xFF) - 127
    frac_nz = (bits & 0x7FFFFF) != 0
    n = jnp.maximum(e_unbiased + frac_nz.astype(jnp.int32), 0)

    # scale = 2^-n built exactly from exponent bits; split n so each factor is normal.
    n1 = n >> 1
    n2 = n - n1
    scale1 = pltpu.bitcast((127 - n1) << 23, jnp.float32)
    scale2 = pltpu.bitcast((127 - n2) << 23, jnp.float32)
    s_final = (s * scale1) * scale2                               # == s * 2^-n exactly

    # return X.sum()  (scalar)
    out_ref[0, 0] = s_final[0, 0]


def fixed_hidden_mlp(x, lin_w, lin_b, rand_w):
    """x: (B, 20); lin_w: (20, 20) PyTorch (out, in); lin_b: (20,); rand_w: (20, 20)."""
    B, D = x.shape
    BP, DP = 8, 128   # sublane / lane aligned padded shapes

    # Zero padding is inert: padded feature cols are zero in x/W/b, and the bias
    # slab has zero rows for padded batch entries, so padded rows of h stay 0
    # through both linears and the relu, leaving both sums unchanged.
    x_p = jnp.zeros((BP, DP), jnp.float32).at[:B, :D].set(x)
    wT_p = jnp.zeros((DP, DP), jnp.float32).at[:D, :D].set(lin_w.T)
    rw_p = jnp.zeros((DP, DP), jnp.float32).at[:D, :D].set(rand_w)
    b_p = jnp.zeros((BP, DP), jnp.float32).at[:B, :D].set(
        jnp.broadcast_to(lin_b, (B, D)))

    out = pl.pallas_call(
        fixed_hidden_mlp_kernel,
        out_shape=jax.ShapeDtypeStruct((1, 1), jnp.float32),
        in_specs=[pl.BlockSpec(memory_space=pltpu.MemorySpace.VMEM)] * 4,
        out_specs=pl.BlockSpec(memory_space=pltpu.MemorySpace.SMEM),
    )(x_p, wT_p, b_p, rw_p)
    return out[0, 0]


def fixed_hidden_mlp_ref(x, lin_w, lin_b, rand_w):
    h = x @ lin_w.T + lin_b
    h = jnp.maximum(h @ rand_w, 0.0)
    h = h @ lin_w.T + lin_b

    def cond(c):
        return jnp.sum(jnp.abs(c)) > 1.0

    def body(c):
        return c / 2.0

    h = lax.while_loop(cond, body, h)
    return jnp.sum(h)


if __name__ == "__main__":
    key = jax.random.PRNGKey(0)
    k_x, k_w, k_b, k_r = jax.random.split(key, 4)

    B, D = 2, 20                                    # X = torch.rand(2, 20)
    x = jax.random.uniform(k_x, (B, D), jnp.float32)

    # nn.Linear(20, 20) default init: U(-1/sqrt(fan_in), 1/sqrt(fan_in))
    bound = 1.0 / (D ** 0.5)
    lin_w = jax.random.uniform(k_w, (D, D), jnp.float32, -bound, bound)
    lin_b = jax.random.uniform(k_b, (D,), jnp.float32, -bound, bound)

    # rand_weight = torch.rand(20, 20) — fixed, non-trainable
    rand_w = jax.random.uniform(k_r, (D, D), jnp.float32)

    out = jax.block_until_ready(fixed_hidden_mlp(x, lin_w, lin_b, rand_w))
    ref = jax.block_until_ready(fixed_hidden_mlp_ref(x, lin_w, lin_b, rand_w))

    assert jnp.isfinite(out), "kernel produced non-finite output"
    assert jnp.allclose(out, ref, rtol=1e-5, atol=1e-6), (out, ref)
    print("KERNEL_OK")
</pallas_src>

<mosaic_0001>
module attributes {stable_mosaic.version = 11 : i64} {
  func.func @fixed_hidden_mlp_kernel(%arg0: memref<8x128xf32, #tpu.memory_space<vmem>>, %arg1: memref<128x128xf32, #tpu.memory_space<vmem>>, %arg2: memref<8x128xf32, #tpu.memory_space<vmem>>, %arg3: memref<128x128xf32, #tpu.memory_space<vmem>>, %arg4: memref<1x1xf32, #tpu.memory_space<smem>>) attributes {dimension_semantics = [], scalar_prefetch = 0 : i64, scratch_operands = 0 : i64, tpu.core_type = #tpu.core_type<tc>} {
    %c0 = arith.constant 0 : index
    %c0_0 = arith.constant 0 : index
    %0 = vector.load %arg0[%c0, %c0_0] : memref<8x128xf32, #tpu.memory_space<vmem>>, vector<8x128xf32>
    %c0_1 = arith.constant 0 : index
    %c0_2 = arith.constant 0 : index
    %1 = vector.load %arg1[%c0_1, %c0_2] : memref<128x128xf32, #tpu.memory_space<vmem>>, vector<128x128xf32>
    %c0_3 = arith.constant 0 : index
    %c0_4 = arith.constant 0 : index
    %2 = vector.load %arg2[%c0_3, %c0_4] : memref<8x128xf32, #tpu.memory_space<vmem>>, vector<8x128xf32>
    %c0_5 = arith.constant 0 : index
    %c0_6 = arith.constant 0 : index
    %3 = vector.load %arg3[%c0_5, %c0_6] : memref<128x128xf32, #tpu.memory_space<vmem>>, vector<128x128xf32>
    %cst = arith.constant dense<0.000000e+00> : vector<8x128xf32>
    %4 = tpu.matmul %0, %1, %cst {dimension_numbers = #tpu.dot_dimension_numbers<[1], [0], [0], [1], [0, 0, 1, 1], [], []>} : vector<8x128xf32>, vector<128x128xf32>, vector<8x128xf32> -> vector<8x128xf32>
    %5 = arith.addf %4, %2 : vector<8x128xf32>
    %cst_7 = arith.constant dense<0.000000e+00> : vector<8x128xf32>
    %6 = tpu.matmul %5, %3, %cst_7 {dimension_numbers = #tpu.dot_dimension_numbers<[1], [0], [0], [1], [0, 0, 1, 1], [], []>} : vector<8x128xf32>, vector<128x128xf32>, vector<8x128xf32> -> vector<8x128xf32>
    %cst_8 = arith.constant 0.000000e+00 : f32
    %7 = vector.broadcast %cst_8 : f32 to vector<8x128xf32>
    %8 = arith.maximumf %6, %7 : vector<8x128xf32>
    %cst_9 = arith.constant dense<0.000000e+00> : vector<8x128xf32>
    %9 = tpu.matmul %8, %1, %cst_9 {dimension_numbers = #tpu.dot_dimension_numbers<[1], [0], [0], [1], [0, 0, 1, 1], [], []>} : vector<8x128xf32>, vector<128x128xf32>, vector<8x128xf32> -> vector<8x128xf32>
    %10 = arith.addf %9, %2 : vector<8x128xf32>
    %11 = math.absf %10 : vector<8x128xf32>
    %12 = tpu.concatenate %10, %11 in 0 : vector<8x128xf32>, vector<8x128xf32> -> vector<16x128xf32>
    %cst_10 = arith.constant dense<0.000000e+00> : vector<16xf32>
    %13 = vector.multi_reduction <add>, %12, %cst_10 [1] : vector<16x128xf32> to vector<16xf32>
    %14 = vector.shape_cast %13 : vector<16xf32> to vector<16x1xf32>
    %15 = vector.extract_strided_slice %14 {offsets = [0, 0], sizes = [8, 1], strides = [1, 1]} : vector<16x1xf32> to vector<8x1xf32>
    %16 = vector.shape_cast %15 : vector<8x1xf32> to vector<1x8x1xf32>
    %cst_11 = arith.constant dense<0.000000e+00> : vector<1xf32>
    %17 = vector.multi_reduction <add>, %16, %cst_11 [1, 2] : vector<1x8x1xf32> to vector<1xf32>
    %18 = vector.shape_cast %17 : vector<1xf32> to vector<1x1x1xf32>
    %19 = vector.extract %18[0, 0, 0] : f32 from vector<1x1x1xf32>
    %20 = vector.broadcast %19 : f32 to vector<1x1xf32>
    %21 = vector.extract_strided_slice %14 {offsets = [8, 0], sizes = [8, 1], strides = [1, 1]} : vector<16x1xf32> to vector<8x1xf32>
    %22 = vector.shape_cast %21 : vector<8x1xf32> to vector<1x8x1xf32>
    %cst_12 = arith.constant dense<0.000000e+00> : vector<1xf32>
    %23 = vector.multi_reduction <add>, %22, %cst_12 [1, 2] : vector<1x8x1xf32> to vector<1xf32>
    %24 = vector.shape_cast %23 : vector<1xf32> to vector<1x1x1xf32>
    %25 = vector.extract %24[0, 0, 0] : f32 from vector<1x1x1xf32>
    %26 = vector.broadcast %25 : f32 to vector<1x1xf32>
    %27 = tpu.bitcast %26 : vector<1x1xf32> -> vector<1x1xi32>
    %c23_i32 = arith.constant 23 : i32
    %28 = vector.broadcast %c23_i32 : i32 to vector<1x1xi32>
    %29 = arith.shrsi %27, %28 : vector<1x1xi32>
    %c255_i32 = arith.constant 255 : i32
    %30 = vector.broadcast %c255_i32 : i32 to vector<1x1xi32>
    %31 = arith.andi %29, %30 : vector<1x1xi32>
    %c127_i32 = arith.constant 127 : i32
    %32 = vector.broadcast %c127_i32 : i32 to vector<1x1xi32>
    %33 = arith.subi %31, %32 : vector<1x1xi32>
    %c8388607_i32 = arith.constant 8388607 : i32
    %34 = vector.broadcast %c8388607_i32 : i32 to vector<1x1xi32>
    %35 = arith.andi %27, %34 : vector<1x1xi32>
    %c0_i32 = arith.constant 0 : i32
    %36 = vector.broadcast %c0_i32 : i32 to vector<1x1xi32>
    %37 = arith.cmpi ne, %35, %36 : vector<1x1xi32>
    %38 = arith.extui %37 : vector<1x1xi1> to vector<1x1xi32>
    %39 = arith.addi %33, %38 : vector<1x1xi32>
    %c0_i32_13 = arith.constant 0 : i32
    %40 = vector.broadcast %c0_i32_13 : i32 to vector<1x1xi32>
    %41 = arith.maxsi %39, %40 : vector<1x1xi32>
    %c1_i32 = arith.constant 1 : i32
    %42 = vector.broadcast %c1_i32 : i32 to vector<1x1xi32>
    %43 = arith.shrsi %41, %42 : vector<1x1xi32>
    %44 = arith.subi %41, %43 : vector<1x1xi32>
    %c127_i32_14 = arith.constant 127 : i32
    %45 = vector.broadcast %c127_i32_14 : i32 to vector<1x1xi32>
    %46 = arith.subi %45, %43 : vector<1x1xi32>
    %c23_i32_15 = arith.constant 23 : i32
    %47 = vector.broadcast %c23_i32_15 : i32 to vector<1x1xi32>
    %48 = arith.shli %46, %47 : vector<1x1xi32>
    %49 = tpu.bitcast %48 : vector<1x1xi32> -> vector<1x1xf32>
    %c127_i32_16 = arith.constant 127 : i32
    %50 = vector.broadcast %c127_i32_16 : i32 to vector<1x1xi32>
    %51 = arith.subi %50, %44 : vector<1x1xi32>
    %c23_i32_17 = arith.constant 23 : i32
    %52 = vector.broadcast %c23_i32_17 : i32 to vector<1x1xi32>
    %53 = arith.shli %51, %52 : vector<1x1xi32>
    %54 = tpu.bitcast %53 : vector<1x1xi32> -> vector<1x1xf32>
    %55 = arith.mulf %20, %49 : vector<1x1xf32>
    %56 = arith.mulf %55, %54 : vector<1x1xf32>
    %57 = vector.extract %56[0, 0] : f32 from vector<1x1xf32>
    %c0_18 = arith.constant 0 : index
    %c0_19 = arith.constant 0 : index
    %58 = memref.load %arg4[%c0_18, %c0_19] : memref<1x1xf32, #tpu.memory_space<smem>>
    memref.store %57, %arg4[%c0_18, %c0_19] : memref<1x1xf32, #tpu.memory_space<smem>>
    return
  }
}

</mosaic_0001>

<bundles_post_ra>
// kernel: tpu_custom_call.1
= control target key start
LH: loop header
LB: loop body
LE: loop exit
PB: predicated region body
PF: predicated region fallthrough
CT: control target
= control target key end

     0   :  { %9 = vsyncpa [#allocation3], 0  ;;  %s877_s0 = inlined_call_operand.hbm [shape: f32[8,128], index: 0, kind: input, shape index: {}]   ;;  %s878_s1 = inlined_call_operand.hbm [shape: f32[128,128], index: 1, kind: input, shape index: {}]   ;;  %s879_s2 = inlined_call_operand.hbm [shape: f32[8,128], index: 2, kind: input, shape index: {}]   ;;  %s880_s3 = inlined_call_operand.hbm [shape: f32[128,128], index: 3, kind: input, shape index: {}]   ;;  %s881_s4 = inlined_call_operand.hbm [shape: f32[1,1], index: 4, kind: output, shape index: {}]  }
   0x1   :  { %10 = vsyncpa [#allocation6], 0 }
   0x2   :  { %11 = vsyncpa [#allocation9], 0 }
   0x3   :  { %12 = vsyncpa [#allocation4], 0  ;;  %s733_s15 = smov [#allocation5]   ;;  %s627_s19 = scalar_lea.hbm %s878_s1, 2048 }
   0x4   :  { %s28_s16 = sshll.u32 %s733_s15, 4  ;;  %p628_p0 = scmp.ne.s32.totalorder %s878_s1, %s627_s19  ;;  %s29_s16 = int_to_ptr.vmem [resolvable:$true] %s28_s16 }
   0x5   :  { %p631_p1 = scmp.lt.u32.totalorder %s627_s19, %s878_s1 }
   0x7   :  { %p633_p2 = pnand %p631_p1, %p628_p0 }
   0x9   :  { %636 = shalt.err (!%p633_p2)
}
   0xa   :  { %s637_s24 = scalar_lea.vmem %s29_s16, 2048  ;;  %p642_p4 = scmp.lt.s32.totalorder %s29_s16, %s29_s16 }
   0xb   :  { %p638_p3 = scmp.ne.s32.totalorder %s29_s16, %s637_s24  ;;  %p643_p5 = scmp.lt.s32.totalorder %s637_s24, %s637_s24 }
   0xd   :  { %p644_p6 = por %p643_p5, %p642_p4 }
   0xf   :  { %p645_p7 = pnand %p644_p6, %p638_p3 }
  0x11   :  { %648 = shalt.err (!%p645_p7)
}
  0x12   :  { %s734_s25 = smov 128   ;;  %s735_s26 = smov 8  }
  0x13   :  { %34 = dma.hbm_to_vmem [thread:$0]  %s878_s1, 2048, %s29_s16, [#allocation6], %s734_s25, %s734_s25, %s735_s26  }
  0x14   :  { %s736_s29 = smov [#allocation2]   ;;  %s737_s5 = smov [#allocation7]  }
  0x15   :  { %s19_s30 = sshll.u32 %s736_s29, 4  ;;  %s41_s6 = sshll.u32 %s737_s5, 4  ;;  %s20_s30 = int_to_ptr.vmem [resolvable:$true] %s19_s30  ;;  %s42_s6 = int_to_ptr.vmem [resolvable:$true] %s41_s6 }
  0x16   :  { %s649_s9 = scalar_lea.hbm %s877_s0, 128 }
  0x17   :  { %p650_p8 = scmp.ne.s32.totalorder %s877_s0, %s649_s9  ;;  %p653_p9 = scmp.lt.u32.totalorder %s649_s9, %s877_s0 }
  0x19   :  { %p655_p10 = pnand %p653_p9, %p650_p8 }
  0x1b   :  { %658 = shalt.err (!%p655_p10)
}
  0x1c   :  { %s659_s1 = scalar_lea.vmem %s20_s30, 128  ;;  %p664_p12 = scmp.lt.s32.totalorder %s20_s30, %s20_s30 }
  0x1d   :  { %p660_p11 = scmp.ne.s32.totalorder %s20_s30, %s659_s1  ;;  %p665_p13 = scmp.lt.s32.totalorder %s659_s1, %s659_s1 }
  0x1f   :  { %p666_p0 = por %p665_p13, %p664_p12 }
  0x21   :  { %p667_p1 = pnand %p666_p0, %p660_p11 }
  0x23   :  { %670 = shalt.err (!%p667_p1)
}
  0x24   :  { %22 = dma.hbm_to_vmem [thread:$0]  %s877_s0, 128, %s20_s30, [#allocation3]  }
  0x25   :  { %s671_s18 = scalar_lea.hbm %s879_s2, 128 }
  0x26   :  { %p672_p2 = scmp.ne.s32.totalorder %s879_s2, %s671_s18  ;;  %p675_p3 = scmp.lt.u32.totalorder %s671_s18, %s879_s2 }
  0x28   :  { %p677_p4 = pnand %p675_p3, %p672_p2 }
  0x2a   :  { %680 = shalt.err (!%p677_p4)
}
  0x2b   :  { %s681_s23 = scalar_lea.vmem %s42_s6, 128  ;;  %p686_p6 = scmp.lt.s32.totalorder %s42_s6, %s42_s6 }
  0x2c   :  { %p682_p5 = scmp.ne.s32.totalorder %s42_s6, %s681_s23  ;;  %p687_p7 = scmp.lt.s32.totalorder %s681_s23, %s681_s23 }
  0x2e   :  { %p688_p8 = por %p687_p7, %p686_p6 }
  0x30   :  { %p689_p9 = pnand %p688_p8, %p682_p5 }
  0x32   :  { %692 = shalt.err (!%p689_p9)
}
  0x33   :  { %44 = dma.hbm_to_vmem [thread:$0]  %s879_s2, 128, %s42_s6, [#allocation6]  }
  0x34   :  { %s738_s27 = smov [#allocation8]   ;;  %s693_s5 = scalar_lea.hbm %s880_s3, 2048 }
  0x35   :  { %s50_s28 = sshll.u32 %s738_s27, 4  ;;  %p694_p10 = scmp.ne.s32.totalorder %s880_s3, %s693_s5  ;;  %s51_s28 = int_to_ptr.vmem [resolvable:$true] %s50_s28 }
  0x36   :  { %p697_p11 = scmp.lt.u32.totalorder %s693_s5, %s880_s3 }
  0x38   :  { %p699_p12 = pnand %p697_p11, %p694_p10 }
  0x3a   :  { %702 = shalt.err (!%p699_p12)
}
  0x3b   :  { %s703_s11 = scalar_lea.vmem %s51_s28, 2048  ;;  %p708_p0 = scmp.lt.s32.totalorder %s51_s28, %s51_s28 }
  0x3c   :  { %p704_p13 = scmp.ne.s32.totalorder %s51_s28, %s703_s11  ;;  %p709_p1 = scmp.lt.s32.totalorder %s703_s11, %s703_s11 }
  0x3e   :  { %p710_p2 = por %p709_p1, %p708_p0 }
  0x40   :  { %p711_p3 = pnand %p710_p2, %p704_p13 }
  0x42   :  { %714 = shalt.err (!%p711_p3)
}
  0x43   :  { %56 = dma.hbm_to_vmem [thread:$0]  %s880_s3, 2048, %s51_s28, [#allocation9], %s734_s25, %s734_s25, %s735_s26  }
  0x44   :  { %725 = dma.done.wait [#allocation3], 128  }
  0x45   :  { %726 = vsyncadd [#allocation3], 4294967168 }
  0x46   :  { %727 = dma.done.wait [#allocation6], 2176  }
  0x47   :  { %728 = vsyncadd [#allocation6], 4294965120 }
  0x48   :  { %729 = dma.done.wait [#allocation9], 2048  }
  0x49   :  { %730 = vsyncadd [#allocation9], 4294965248  ;;  %v739_v0 = vmov 0.0|0.0   ;;  %vm740_vm0 = vmmov 0   ;;  %v741_v1 = vmov 0.0   ;;  %v70_v2 = vld [vmem:[#allocation5] sm:$0xff] }
  0x4a   :  { %538 = vmatprep.subr.bf16.mxu0 %v739_v0  ;;  %465 = vmatprep.mubr.msk.f32.mxu0 %vm740_vm0, %v741_v1  ;;  %v71_v3 = vld [vmem:[#allocation5 + $0x8] sm:$0xff]  ;;  %v72_v4 = vld [vmem:[#allocation5 + $0x10] sm:$0xff]  ;;  %v73_v6 = vld [vmem:[#allocation5 + $0x18] sm:$0xff]  ;;  %vm319_vm1 = vcmask 7168   ;;  %s715_s1 = scalar_lea.hbm %s881_s4, 16 }
  0x4b   :  { %562 = vmatprep.subr.bf16.mxu1 %v739_v0  ;;  %500 = vmatprep.mubr.msk.f32.mxu1 %vm740_vm0, %v741_v1  ;;  %v829_v5 = vpack.c.bf16 %v71_v3, %v70_v2  ;;  %v832_v7 = vpack.c.bf16 %v73_v6, %v72_v4  ;;  %v74_v8 = vld [vmem:[#allocation5 + $0x20] sm:$0xff]  ;;  %v75_v9 = vld [vmem:[#allocation5 + $0x28] sm:$0xff]  ;;  %v88_v11 = vld [vmem:[#allocation8 + $0x8] sm:$0xff]  ;;  %p716_p4 = scmp.ne.s32.totalorder %s881_s4, %s715_s1  ;;  %p719_p5 = scmp.lt.u32.totalorder %s715_s1, %s881_s4 }
  0x4c   :  { %v87_v10 = vld [vmem:[#allocation8] sm:$0xff]  ;;  %v89_v12 = vld [vmem:[#allocation8 + $0x10] sm:$0xff]  ;;  %v90_v13 = vld [vmem:[#allocation8 + $0x18] sm:$0xff]  ;;  %v836_v14 = vpack.c.bf16 %v75_v9, %v74_v8 }
  0x4d   :  { %540 = vmatpush3.bf16.msra.mxu0 %v829_v5  ;;  %v563_v15 = vpack.c.bf16 %v88_v11, %v87_v10  ;;  %v76_v16 = vld [vmem:[#allocation5 + $0x30] sm:$0xff]  ;;  %v77_v17 = vld [vmem:[#allocation5 + $0x38] sm:$0xff]  ;;  %v566_v18 = vpack.c.bf16 %v90_v13, %v89_v12  ;;  %v91_v19 = vld [vmem:[#allocation8 + $0x20] sm:$0xff]  ;;  %p721_p6 = pnand %p719_p5, %p716_p4 }
  0x4e   :  { %541 = vmatprep.subr.bf16.mxu0 %v739_v0  ;;  %v92_v20 = vld [vmem:[#allocation8 + $0x28] sm:$0xff]  ;;  %v548_v21 = vpack.c.bf16 %v77_v17, %v76_v16  ;;  %v78_v22 = vld [vmem:[#allocation5 + $0x40] sm:$0xff]  ;;  %v79_v23 = vld [vmem:[#allocation5 + $0x48] sm:$0xff] }
  0x4f   :  { %564 = vmatpush3.bf16.msra.mxu1 %v563_v15  ;;  %v569_v24 = vpack.c.bf16 %v92_v20, %v91_v19  ;;  %v93_v25 = vld [vmem:[#allocation8 + $0x30] sm:$0xff]  ;;  %v94_v26 = vld [vmem:[#allocation8 + $0x38] sm:$0xff]  ;;  %v551_v27 = vpack.c.bf16 %v79_v23, %v78_v22  ;;  %v80_v28 = vld [vmem:[#allocation5 + $0x50] sm:$0xff] }
  0x50   :  { %565 = vmatprep.subr.bf16.mxu1 %v739_v0  ;;  %v81_v29 = vld [vmem:[#allocation5 + $0x58] sm:$0xff]  ;;  %v572_v30 = vpack.c.bf16 %v94_v26, %v93_v25  ;;  %v95_v31 = vld [vmem:[#allocation8 + $0x40] sm:$0xff]  ;;  %v96_v32 = vld [vmem:[#allocation8 + $0x48] sm:$0xff] }
  0x51   :  { %543 = vmatpush3.bf16.msra.mxu0 %v832_v7  ;;  %v554_v33 = vpack.c.bf16 %v81_v29, %v80_v28  ;;  %v82_v34 = vld [vmem:[#allocation5 + $0x60] sm:$0xff]  ;;  %v83_v35 = vld [vmem:[#allocation5 + $0x68] sm:$0xff]  ;;  %v575_v36 = vpack.c.bf16 %v96_v32, %v95_v31  ;;  %v97_v37 = vld [vmem:[#allocation8 + $0x50] sm:$0xff] }
  0x52   :  { %544 = vmatprep.subr.bf16.mxu0 %v739_v0  ;;  %v98_v38 = vld [vmem:[#allocation8 + $0x58] sm:$0xff]  ;;  %v557_v39 = vpack.c.bf16 %v83_v35, %v82_v34  ;;  %v84_v40 = vld [vmem:[#allocation5 + $0x70] sm:$0xff]  ;;  %v85_v41 = vld [vmem:[#allocation5 + $0x78] sm:$0xff] }
  0x53   :  { %567 = vmatpush3.bf16.msra.mxu1 %v566_v18  ;;  %v578_v42 = vpack.c.bf16 %v98_v38, %v97_v37  ;;  %v99_v43 = vld [vmem:[#allocation8 + $0x60] sm:$0xff]  ;;  %v100_v44 = vld [vmem:[#allocation8 + $0x68] sm:$0xff]  ;;  %v560_v45 = vpack.c.bf16 %v85_v41, %v84_v40  ;;  %v69_v47 = vld [vmem:[#allocation2] sm:$0xff] }
  0x54   :  { %568 = vmatprep.subr.bf16.mxu1 %v739_v0  ;;  %v581_v46 = vpack.c.bf16 %v100_v44, %v99_v43  ;;  %v101_v48 = vld [vmem:[#allocation8 + $0x70] sm:$0xff]  ;;  %v102_v49 = vld [vmem:[#allocation8 + $0x78] sm:$0xff] }
  0x55   :  { %546 = vmatpush3.bf16.msra.mxu0 %v836_v14  ;;  %v584_v50 = vpack.c.bf16 %v102_v49, %v101_v48  ;;  %v86_v51 = vld [vmem:[#allocation7] sm:$0xff] }
  0x56   :  { %547 = vmatprep.subr.bf16.mxu0 %v739_v0 }
  0x57   :  { %570 = vmatpush3.bf16.msra.mxu1 %v569_v24 }
  0x58   :  { %571 = vmatprep.subr.bf16.mxu1 %v739_v0 }
  0x59   :  { %549 = vmatpush3.bf16.msra.mxu0 %v548_v21 }
  0x5a   :  { %550 = vmatprep.subr.bf16.mxu0 %v739_v0 }
  0x5b   :  { %573 = vmatpush3.bf16.msra.mxu1 %v572_v30 }
  0x5c   :  { %574 = vmatprep.subr.bf16.mxu1 %v739_v0 }
  0x5d   :  { %552 = vmatpush3.bf16.msra.mxu0 %v551_v27 }
  0x5e   :  { %553 = vmatprep.subr.bf16.mxu0 %v739_v0 }
  0x5f   :  { %576 = vmatpush3.bf16.msra.mxu1 %v575_v36 }
  0x60   :  { %577 = vmatprep.subr.bf16.mxu1 %v739_v0 }
  0x61   :  { %555 = vmatpush3.bf16.msra.mxu0 %v554_v33 }
  0x62   :  { %556 = vmatprep.subr.bf16.mxu0 %v739_v0 }
  0x63   :  { %579 = vmatpush3.bf16.msra.mxu1 %v578_v42 }
  0x64   :  { %580 = vmatprep.subr.bf16.mxu1 %v739_v0 }
  0x65   :  { %558 = vmatpush3.bf16.msra.mxu0 %v557_v39 }
  0x66   :  { %559 = vmatprep.subr.bf16.mxu0 %v739_v0 }
  0x67   :  { %582 = vmatpush3.bf16.msra.mxu1 %v581_v46 }
  0x68   :  { %583 = vmatprep.subr.bf16.mxu1 %v739_v0 }
  0x69   :  { %561 = vmatpush3.bf16.msra.mxu0 %v560_v45 }
  0x6a   :  { %586 = vmatprep.subr.bf16.mxu0 %v739_v0 }
  0x6b   :  { %585 = vmatpush3.bf16.msra.mxu1 %v584_v50 }
  0x6c   :  { %466 = vmatmul.mubr.f32.vlgmr.msra.gmra.mrb[0].mxu0 %v69_v47 }
  0x6d   :  { %588 = vmatpush3.bf16.msra.mxu0 %v829_v5  ;;  %535 = vmatprep.mubr.msk.f32.mxu0 %vm740_vm0, %v741_v1 }
  0x6e   :  { %589 = vmatprep.subr.bf16.mxu0 %v739_v0 }
  0x71   :  { %591 = vmatpush3.bf16.msra.mxu0 %v832_v7 }
  0x72   :  { %592 = vmatprep.subr.bf16.mxu0 %v739_v0 }
  0x75   :  { %594 = vmatpush3.bf16.msra.mxu0 %v836_v14 }
  0x76   :  { %595 = vmatprep.subr.bf16.mxu0 %v739_v0 }
  0x79   :  { %597 = vmatpush3.bf16.msra.mxu0 %v548_v21  ;;  %v742_v21 = vmov 0  }
  0x7a   :  { %598 = vmatprep.subr.bf16.mxu0 %v739_v0 }
  0x7d   :  { %600 = vmatpush3.bf16.msra.mxu0 %v551_v27 }
  0x7e   :  { %601 = vmatprep.subr.bf16.mxu0 %v739_v0 }
  0x81   :  { %603 = vmatpush3.bf16.msra.mxu0 %v554_v33 }
  0x82   :  { %604 = vmatprep.subr.bf16.mxu0 %v739_v0 }
  0x85   :  { %606 = vmatpush3.bf16.msra.mxu0 %v557_v39 }
  0x86   :  { %607 = vmatprep.subr.bf16.mxu0 %v739_v0 }
  0x89   :  { %609 = vmatpush3.bf16.msra.mxu0 %v560_v45 }
 0x13f   :  { %v169_v52 = vpop.f32.mrb[0].mxu0 }
 0x140   :  { %v170_v53 = vadd.f32 %v169_v52, %v86_v51  ;;  %v467_v54 = vpop.f32.mrb[1].mxu0 }
 0x142   :  { %501 = vmatmul.mubr.f32.vlgmr.msra.gmra.mrb[0].mxu1 %v170_v53 }
 0x215   :  { %v239_v55 = vpop.f32.mrb[0].mxu1 }
 0x216   :  { %v243_v56 = vmax.f32 %v239_v55, 0.0  ;;  %v502_v57 = vpop.f32.mrb[1].mxu1 }
 0x218   :  { %536 = vmatmul.mubr.f32.vlgmr.msra.gmra.mrb[2].mxu0 %v243_v56 }
 0x2eb   :  { %v310_v58 = vpop.f32.mrb[2].mxu0 }
 0x2ec   :  { %v311_v59 = vadd.f32 %v310_v58, %v86_v51  ;;  %v537_v60 = vpop.f32.mrb[3].mxu0 }
 0x2ee   :  { %315 = vadd.xlane.f32.xlu0 %v311_v59  ;;  %v314_v61 = vand.u32 2147483647, %v311_v59 }
 0x2f2   :  { %317 = vadd.xlane.f32.xlu0 %v314_v61 }
 0x37b   :  { %v316_v62 = vpop.xlane.xlu0 %315 }
 0x37c   :  { %v320_v63 = vsel %vm319_vm1, %v316_v62, 0.0 }
 0x37d   :  { %321 = vadd.xlane.f32.xlu1 %v320_v63 }
 0x37f   :  { %v318_v0 = vpop.xlane.xlu0 %317 }
 0x380   :  { %v331_v1 = vsel %vm319_vm1, %v318_v0, 0.0 }
 0x381   :  { %332 = vadd.xlane.f32.xlu1 %v331_v1 }
 0x40a   :  { %v322_v2 = vpop.xlane.xlu1 %321 }
 0x40b   :  { %v323_v3 = vrot.slane %v322_v2, 4 }
 0x40d   :  { %v324_v4 = vadd.f32 %v323_v3, %v322_v2 }
 0x40e   :  { %v333_v5 = vpop.xlane.xlu1 %332 }
 0x40f   :  { %v325_v6 = vrot.slane %v324_v4, 2  ;;  %v334_v7 = vrot.slane %v333_v5, 4 }
 0x411   :  { %v335_v8 = vadd.f32 %v334_v7, %v333_v5  ;;  %v326_v9 = vadd.f32 %v325_v6, %v324_v4 }
 0x413   :  { %v336_v10 = vrot.slane %v335_v8, 2  ;;  %v327_v11 = vrot.slane %v326_v9, 1 }
 0x415   :  { %v337_v12 = vadd.f32 %v336_v10, %v335_v8  ;;  %v328_v13 = vadd.f32 %v327_v11, %v326_v9 }
 0x417   :  { %610 = vpush %v328_v13  ;;  %v338_v14 = vrot.slane %v337_v12, 1 }
 0x419   :  { %v339_v15 = vadd.f32 %v338_v14, %v337_v12 }
 0x41b   :  { %612 = vpush %v339_v15 }
 0x448   :  { %s611_s3 = spop %610 }
 0x449   :  { %v330_v30 = vstv %s611_s3 }
 0x44c   :  { %s613_s25 = spop %612 }
 0x44d   :  { %v341_v16 = vstv %s613_s25 }
 0x44e   :  { %v343_v17 = vshra.s32 %v341_v16, 23  ;;  %v346_v18 = vand.u32 8388607, %v341_v16 }
 0x450   :  { %v344_v19 = vand.u32 255, %v343_v17  ;;  %vm347_vm2 = vcmp.ne.s32.totalorder %v346_v18, 0 }
 0x451   :  { %v348_v22 = vsel %vm347_vm2, 1, %v742_v21 }
 0x452   :  { %v381_v20 = vadd.s32 4294967169, %v344_v19 }
 0x454   :  { %v349_v23 = vadd.s32 %v381_v20, %v348_v22 }
 0x456   :  { %vm350_vm3 = vcmp.gt.s32.totalorder %v349_v23, 0 }
 0x457   :  { %v351_v24 = vsel %vm350_vm3, %v349_v23, 0 }
 0x458   :  { %v352_v25 = vshra.s32 %v351_v24, 1 }
 0x45a   :  { %v353_v26 = vsub.s32 %v351_v24, %v352_v25  ;;  %v354_v27 = vsub.s32 127, %v352_v25 }
 0x45c   :  { %v355_v28 = vshll.u32 %v354_v27, 23  ;;  %v357_v29 = vsub.s32 127, %v353_v26 }
 0x45e   :  { %v358_v31 = vshll.u32 %v357_v29, 23  ;;  %v360_v32 = vmul.f32 %v355_v28, %v330_v30 }
 0x460   :  { %v361_v33 = vmul.f32 %v360_v32, %v358_v31 }
 0x462   :  { %614 = vpush %v361_v33 }
 0x493   :  { %s615_s26 = spop %614 }
 0x494   :  { %364 = sst [smem:[#allocation10]] %s615_s26 }
 0x495   :  { %724 = shalt.err (!%p721_p6)
}
 0x496   :  { %s743_s18 = smov [#allocation10]  }
 0x497   :  { %372 = dma.smem_to_hbm %s743_s18, 16, %s881_s4, [#allocation4]  }
 0x498   :  { %731 = dma.done.wait [#allocation4], 16  }
 0x499   :  { %732 = vsyncadd [#allocation4], 4294967280 }
 0x49a   :  { %376 = sfence }
 0x49b   :  { %377 = vsyncpa [#allocation3], 1 }
 0x49c   :  { %378 = vsyncpa [#allocation6], 1 }
 0x49d   :  { %379 = vsyncpa [#allocation9], 1 }
 0x49e   :  { %380 = vsyncpa [#allocation4], 1 }

</bundles_post_ra>
